<compile_context>
chip_gen: v7x
topology: tpu7x:2x2x1
jax: 0.10.0
libtpu: 0.0.40
codegen_flags: <defaults>
</compile_context>

<pallas_src>
import functools

import jax
import jax.numpy as jnp
from jax import lax
from jax.experimental import pallas as pl
from jax.experimental.pallas import tpu as pltpu

# ----------------------------- config (small) -----------------------------
BERT_HIDDEN = 32      # Bert_model.config.hidden_size (synthetic, small)
QWEN_HIDDEN = 64      # qwen_model.config.hidden_size (synthetic, small)
VOCAB = 128           # synthetic Qwen vocab
PAD_ID = 0            # qwen_tokenizer.pad_token_id (synthetic)
EOS_ID = 3            # qwen_tokenizer.eos_token_id (synthetic)
MAX_SEQ_LEN = 512     # self.max_seq_len
MAX_NEW_TOKENS = 6    # original loop: stop after `5 < len(answer)`


def _round_up(x, m):
    return ((x + m - 1) // m) * m


# --------------------------- kernel 1: projector ---------------------------
def _projector_kernel(x_ref, w_ref, b_ref, o_ref):
    # bf16 MXU inputs, fp32 accumulation, fp32 bias add; cast to half (bf16,
    # standing in for the PyTorch `.half()`) only on the final store.
    x16 = x_ref[...].astype(jnp.bfloat16)
    acc = jnp.dot(x16, w_ref[...], preferred_element_type=jnp.float32)
    o_ref[...] = (acc + b_ref[...]).astype(o_ref.dtype)


def projector(pooler_out_f32, w_bf16, b_row_f32):
    """(N, BERT_HIDDEN) f32 -> (N, QWEN_HIDDEN) bf16, row-tiled over N."""
    n = pooler_out_f32.shape[0]
    # Real sizes: 256-row tiles (keeps (tile, H) blocks well inside v7x's
    # 64 MiB VMEM); toy sizes: one 8-row tile.  Weight/bias blocks resident.
    tile_m = min(256, _round_up(n, 8))
    n_pad = _round_up(n, tile_m)
    x = pooler_out_f32
    if n_pad != n:
        x = jnp.pad(x, ((0, n_pad - n), (0, 0)))
    out = pl.pallas_call(
        _projector_kernel,
        out_shape=jax.ShapeDtypeStruct((n_pad, QWEN_HIDDEN), jnp.bfloat16),
        grid=(n_pad // tile_m,),
        in_specs=[
            pl.BlockSpec((tile_m, BERT_HIDDEN), lambda i: (i, 0)),
            pl.BlockSpec((BERT_HIDDEN, QWEN_HIDDEN), lambda i: (0, 0)),  # resident
            pl.BlockSpec((1, QWEN_HIDDEN), lambda i: (0, 0)),            # resident
        ],
        out_specs=pl.BlockSpec((tile_m, QWEN_HIDDEN), lambda i: (i, 0)),
        compiler_params=pltpu.CompilerParams(
            dimension_semantics=("parallel",)),
    )(x, w_bf16, b_row_f32)
    return out[:n]


# ------------------------ kernel 2: fused greedy decode --------------------
def _decode_kernel(h0_ref, w_head_ref, embed_ref, tok_ref, cnt_ref,
                   h_sc, unf_sc, tok_sc, *, b_real):
    """Single un-gridded invocation; fully unrolled greedy decode loop.

    h0_ref:     (B_pad, H)       bf16  last-position prompt embedding
    w_head_ref: (H, V)           bf16  pre-transposed tied LM-head weight
    embed_ref:  (V, H)           bf16  token embedding table
    tok_ref:    (B, MAX_NEW)     int32 SMEM output: emitted tokens
    cnt_ref:    (1,)             int32 SMEM output: number of executed steps
    h_sc:       (B_pad, H)       bf16  VMEM: running last hidden state
    unf_sc:     (B_pad, 1)       int32 VMEM: unfinished_sequences
    tok_sc:     (B_pad, 1)       int32 VMEM: this step's tokens (scalar staging)
    """
    b_pad = h_sc.shape[0]

    # ----------------------------- init ------------------------------------
    h_sc[...] = h0_ref[...]
    row = lax.broadcasted_iota(jnp.int32, (b_pad, 1), 0)
    unf_sc[...] = (row < b_real).astype(jnp.int32)   # pad rows start "finished"
    cnt_ref[0] = jnp.int32(0)
    for b in range(b_real):
        for t in range(MAX_NEW_TOKENS):
            tok_ref[b, t] = jnp.int32(PAD_ID)

    # ----------------------- unrolled decode steps --------------------------
    for step in range(MAX_NEW_TOKENS):
        # Cheap scalar predicate: does the original loop still run this step?
        any_unf = unf_sc[0, 0]
        for b in range(1, b_real):
            any_unf = jnp.maximum(any_unf, unf_sc[b, 0])

        @pl.when(any_unf > 0)
        def _step(step=step):
            cnt_ref[0] = cnt_ref[0] + jnp.int32(1)
            unf = unf_sc[...]                                      # (B_pad, 1)

            # logits = h @ W_head : bf16 MXU, fp32 accumulate, lane-dense (B, V).
            logits = jnp.dot(h_sc[...], w_head_ref[...],
                             preferred_element_type=jnp.float32)   # (B_pad, V)
            vmax = jnp.max(logits, axis=-1, keepdims=True)
            lane = lax.broadcasted_iota(jnp.int32, logits.shape, 1)
            idx = jnp.min(jnp.where(logits == vmax, lane, jnp.int32(VOCAB)),
                          axis=-1, keepdims=True)                  # first-occurrence argmax
            toks = idx * unf + jnp.int32(PAD_ID) * (1 - unf)       # (B_pad, 1)

            # Emit this step's tokens as scalar SMEM stores (no lane-sparse
            # masked vector stores, no read-modify-write of the output block).
            tok_sc[...] = toks
            for b in range(b_real):
                tok_ref[b, step] = tok_sc[b, 0]

            # Next-token embedding: one-hot @ table on the MXU (in-VMEM gather).
            # TODO(synk): at real vocab (~150K) replace with a per-row DMA
            # gather from an HBM-resident table (see NOTE at top of file).
            onehot = (lane == toks).astype(embed_ref.dtype)        # (B_pad, V)
            h_sc[...] = jnp.dot(onehot, embed_ref[...],
                                preferred_element_type=jnp.float32
                                ).astype(h_sc.dtype)

            # unfinished *= (token != EOS)
            unf_sc[...] = unf * (toks != jnp.int32(EOS_ID)).astype(jnp.int32)


def greedy_decode(h0_bf16, w_head_bf16, embed_table_bf16):
    """Fused greedy decode: (B, H) initial hidden ->
       ((B, MAX_NEW) int32 tokens, (1,) int32 executed-step count)."""
    b_real = h0_bf16.shape[0]
    b_pad = max(8, _round_up(b_real, 8))            # 8-sublane granule for MXU ops
    h0 = jnp.pad(h0_bf16, ((0, b_pad - b_real), (0, 0)))
    tokens, count = pl.pallas_call(
        functools.partial(_decode_kernel, b_real=b_real),
        out_shape=(jax.ShapeDtypeStruct((b_real, MAX_NEW_TOKENS), jnp.int32),
                   jax.ShapeDtypeStruct((1,), jnp.int32)),
        out_specs=(pl.BlockSpec(memory_space=pltpu.MemorySpace.SMEM),
                   pl.BlockSpec(memory_space=pltpu.MemorySpace.SMEM)),
        scratch_shapes=[
            pltpu.VMEM((b_pad, QWEN_HIDDEN), jnp.bfloat16),   # running hidden state
            pltpu.VMEM((b_pad, 1), jnp.int32),                # unfinished_sequences
            pltpu.VMEM((b_pad, 1), jnp.int32),                # per-step token staging
        ],
    )(h0, w_head_bf16, embed_table_bf16)
    return tokens, count


# ------------------------------ glue helpers ------------------------------
def merge_data(data):
    merged, starts, cur = [], [], 0
    for sub in data:
        starts.append(cur)
        merged.extend(sub)
        cur += len(sub)
    return merged, starts


def stack_and_pad_left(tensors):
    max_len = max(t.shape[0] for t in tensors)
    padded, masks = [], []
    for t in tensors:
        pad = max_len - t.shape[0]
        padded.append(jnp.pad(t, ((pad, 0), (0, 0))))
        masks.append(jnp.concatenate(
            [jnp.zeros((pad,), jnp.int32), jnp.ones((t.shape[0],), jnp.int32)]))
    return jnp.stack(padded), jnp.stack(masks)


# ------------------------------- the model --------------------------------
class LogLLMPallas:
    def __init__(self, key):
        k1, k2, k3, k4, k5 = jax.random.split(key, 5)
        # projector: nn.Linear(BERT_HIDDEN, QWEN_HIDDEN).  Weight pre-cast to
        # bf16 ONCE (MXU-native); bias kept fp32 and pre-shaped to (1, H) so
        # the kernel epilogue is a single fp32 broadcast add.
        self.w_proj = (jax.random.normal(k1, (BERT_HIDDEN, QWEN_HIDDEN),
                                         jnp.float32)
                       / BERT_HIDDEN ** 0.5).astype(jnp.bfloat16)
        self.b_proj = (jax.random.normal(k2, (QWEN_HIDDEN,), jnp.float32)
                       * 0.01).reshape(1, QWEN_HIDDEN)
        # Qwen token-embedding table (also the tied LM-head weight).  The head
        # weight is pre-transposed ONCE to (H, V) so the in-kernel matmul is a
        # plain NN contraction with lane-dense logits.
        self.embed_table = jax.random.normal(
            k3, (VOCAB, QWEN_HIDDEN), jnp.float32).astype(jnp.bfloat16)
        self.w_head = jnp.transpose(self.embed_table)          # (H, V) bf16
        # synthetic instruction tokens (3 padded prompts + attention masks),
        # mimicking self.instruc_tokens from the Qwen tokenizer.
        self.instruc_ids = jax.random.randint(k4, (3, 6), 4, VOCAB)
        self.instruc_att = jnp.array([[1, 1, 1, 1, 1, 1],
                                      [1, 1, 1, 1, 0, 0],
                                      [1, 1, 1, 0, 0, 0]], jnp.int32)
        # synthetic 'The sequence is' answer-prefix token ids (already [1:]).
        self.answer_prefix_ids = jax.random.randint(k5, (3,), 4, VOCAB)

    def _embed(self, ids):
        # TODO(synk): qwen_model.model.embed_tokens is an external pretrained
        # embedding; a synthetic table lookup stands in (plain-JAX glue).
        return self.embed_table[ids]

    def forward(self, sequences_, key):
        sequences = [seq[:MAX_SEQ_LEN] for seq in sequences_]
        data, seq_positions = merge_data(sequences)
        seq_positions = seq_positions[1:]

        # TODO(synk): BertTokenizerFast + BertModel(...).pooler_output are
        # external pretrained components; deterministic synthetic pooler
        # outputs of the right shape stand in (one vector per log message).
        pooler_output = jax.random.normal(
            key, (len(data), BERT_HIDDEN), jnp.float32)

        # projector (Pallas kernel): bf16 MXU matmul, fp32 accumulate + bias,
        # cast to half.
        outputs = projector(pooler_output, self.w_proj, self.b_proj)
        seq_embeddings = jnp.split(outputs, seq_positions, axis=0)

        # prompt assembly (plain-JAX glue, done once).
        instruc_embeddings = self._embed(self.instruc_ids)           # (3, 6, H)
        answer_prefix_embeddings = self._embed(self.answer_prefix_ids)
        ins1 = instruc_embeddings[0][self.instruc_att[0].astype(bool)]
        ins2 = instruc_embeddings[1][self.instruc_att[1].astype(bool)][1:]

        prompt_embeddings = []
        for seq_embedding in seq_embeddings:
            prompt_embeddings.append(jnp.concatenate(
                [ins1, seq_embedding, ins2, answer_prefix_embeddings], axis=0))
        inputs_embeds, attention_mask = stack_and_pad_left(prompt_embeddings)
        # TODO(synk): attention_mask is only consumed by the real (quantized,
        # LoRA) Qwen decoder stack, which is an external pretrained model; the
        # synthetic tied-embedding LM head below does not use it.
        del attention_mask

        # Fused greedy decode: one Pallas call, fully unrolled step loop,
        # pl.when-gated early exit, SMEM token/count outputs.
        h0 = inputs_embeds[:, -1, :]                                 # (B, H) bf16
        tokens, count = greedy_decode(h0, self.w_head, self.embed_table)

        # Single scalar host readback at the very end (replaces the per-step
        # `unfinished.max()` sync): trim steps the original loop never ran.
        # (Note: this trim is host glue and would not work under jax.jit.)
        n_steps = int(count[0])
        return tokens[:, :n_steps]


# ---------------------------------- main -----------------------------------
if __name__ == "__main__":
    key = jax.random.PRNGKey(0)
    k_model, k_data = jax.random.split(key)
    model = LogLLMPallas(k_model)

    # batch of 2 log "sequences", with 3 and 4 log messages respectively.
    sequences_ = [["log msg"] * 3, ["log msg"] * 4]

    answer = model.forward(sequences_, k_data)
    answer = jax.block_until_ready(answer)
    assert answer.shape[0] == 2 and answer.ndim == 2
    assert 1 <= answer.shape[1] <= MAX_NEW_TOKENS
    assert answer.dtype == jnp.int32
    print("KERNEL_OK")
</pallas_src>

<mosaic_0001>
module attributes {stable_mosaic.version = 11 : i64} {
  func.func @_projector_kernel(%arg0: i32, %arg1: memref<8x32xf32, #tpu.memory_space<vmem>>, %arg2: memref<32x64xbf16, #tpu.memory_space<vmem>>, %arg3: memref<1x64xf32, #tpu.memory_space<vmem>>, %arg4: memref<8x64xbf16, #tpu.memory_space<vmem>>) attributes {dimension_semantics = [#tpu.dimension_semantics<parallel>], iteration_bounds = array<i64: 1>, scalar_prefetch = 0 : i64, scratch_operands = 0 : i64, tpu.core_type = #tpu.core_type<tc>, window_params = [{transform_indices = @transform_0, window_bounds = array<i64: 8, 32>}, {pipeline_mode = #tpu.pipeline_mode<synchronous>, transform_indices = @transform_1, window_bounds = array<i64: 32, 64>}, {pipeline_mode = #tpu.pipeline_mode<synchronous>, transform_indices = @transform_2, window_bounds = array<i64: 1, 64>}, {transform_indices = @transform_3, window_bounds = array<i64: 8, 64>}]} {
    %c0 = arith.constant 0 : index
    %c0_0 = arith.constant 0 : index
    %0 = vector.load %arg1[%c0, %c0_0] : memref<8x32xf32, #tpu.memory_space<vmem>>, vector<8x32xf32>
    %1 = arith.truncf %0 : vector<8x32xf32> to vector<8x32xbf16>
    %c0_1 = arith.constant 0 : index
    %c0_2 = arith.constant 0 : index
    %2 = vector.load %arg2[%c0_1, %c0_2] : memref<32x64xbf16, #tpu.memory_space<vmem>>, vector<32x64xbf16>
    %cst = arith.constant dense<0.000000e+00> : vector<8x64xf32>
    %3 = tpu.matmul %1, %2, %cst {dimension_numbers = #tpu.dot_dimension_numbers<[1], [0], [0], [1], [0, 0, 1, 1], [], []>} : vector<8x32xbf16>, vector<32x64xbf16>, vector<8x64xf32> -> vector<8x64xf32>
    %c0_3 = arith.constant 0 : index
    %c0_4 = arith.constant 0 : index
    %4 = vector.load %arg3[%c0_3, %c0_4] : memref<1x64xf32, #tpu.memory_space<vmem>>, vector<1x64xf32>
    %5 = vector.broadcast %4 : vector<1x64xf32> to vector<8x64xf32>
    %6 = arith.addf %3, %5 : vector<8x64xf32>
    %7 = arith.truncf %6 : vector<8x64xf32> to vector<8x64xbf16>
    %c0_5 = arith.constant 0 : index
    %c0_6 = arith.constant 0 : index
    %8 = vector.load %arg4[%c0_5, %c0_6] : memref<8x64xbf16, #tpu.memory_space<vmem>>, vector<8x64xbf16>
    tpu.vector_store %arg4[%c0_5, %c0_6], %7 {strides = array<i32>} : memref<8x64xbf16, #tpu.memory_space<vmem>>, vector<8x64xbf16>,
    return
  }
  func.func @transform_0(%arg0: i32) -> (i32, i32) {
    %c0_i32 = arith.constant 0 : i32
    %c0_i32_0 = arith.constant 0 : i32
    return %arg0, %c0_i32 : i32, i32
  }
  func.func @transform_1(%arg0: i32) -> (i32, i32) {
    %c0_i32 = arith.constant 0 : i32
    %c0_i32_0 = arith.constant 0 : i32
    %c0_i32_1 = arith.constant 0 : i32
    return %c0_i32, %c0_i32_0 : i32, i32
  }
  func.func @transform_2(%arg0: i32) -> (i32, i32) {
    %c0_i32 = arith.constant 0 : i32
    %c0_i32_0 = arith.constant 0 : i32
    %c0_i32_1 = arith.constant 0 : i32
    return %c0_i32, %c0_i32_0 : i32, i32
  }
  func.func @transform_3(%arg0: i32) -> (i32, i32) {
    %c0_i32 = arith.constant 0 : i32
    %c0_i32_0 = arith.constant 0 : i32
    return %arg0, %c0_i32 : i32, i32
  }
}

</mosaic_0001>

<bundles_post_ra>
// kernel: tpu_custom_call.1
= control target key start
LH: loop header
LB: loop body
LE: loop exit
PB: predicated region body
PF: predicated region fallthrough
CT: control target
= control target key end

     0   :  { %8 = vsyncpa [#allocation3], 0  ;;  %s299_s0 = inlined_call_operand.hbm [shape: f32[8,32], index: 0, kind: input, shape index: {}]   ;;  %s300_s1 = inlined_call_operand.hbm [shape: bf16[32,64], index: 1, kind: input, shape index: {}]   ;;  %s301_s2 = inlined_call_operand.vmem [shape: f32[1,64], index: 2, kind: input, shape index: {}]   ;;  %s302_s3 = inlined_call_operand.hbm [shape: bf16[8,64], index: 3, kind: output, shape index: {}]  }
   0x1   :  { %9 = vsyncpa [#allocation6], 0 }
   0x2   :  { %10 = vsyncpa [#allocation4], 0  ;;  %s226_s12 = smov [#allocation2]   ;;  %s227_s14 = smov [#allocation5]  }
   0x3   :  { %s17_s13 = sshll.u32 %s226_s12, 4  ;;  %s26_s15 = sshll.u32 %s227_s14, 4  ;;  %s18_s13 = int_to_ptr.vmem [resolvable:$true] %s17_s13  ;;  %s253_s15 = int_to_ptr.vmem [resolvable:$true] %s26_s15 }
   0x4   :  { %s154_s18 = scalar_lea.hbm %s299_s0, 128 }
   0x5   :  { %p155_p0 = scmp.ne.s32.totalorder %s299_s0, %s154_s18  ;;  %p158_p1 = scmp.lt.u32.totalorder %s154_s18, %s299_s0 }
   0x7   :  { %p160_p2 = pnand %p158_p1, %p155_p0 }
   0x9   :  { %163 = shalt.err (!%p160_p2)
}
   0xa   :  { %s164_s23 = scalar_lea.vmem %s18_s13, 128  ;;  %p169_p4 = scmp.lt.s32.totalorder %s18_s13, %s18_s13 }
   0xb   :  { %p165_p3 = scmp.ne.s32.totalorder %s18_s13, %s164_s23  ;;  %p170_p5 = scmp.lt.s32.totalorder %s164_s23, %s164_s23 }
   0xd   :  { %p171_p6 = por %p170_p5, %p169_p4 }
   0xf   :  { %p172_p7 = pnand %p171_p6, %p165_p3 }
  0x11   :  { %175 = shalt.err (!%p172_p7)
}
  0x12   :  { %20 = dma.hbm_to_vmem [thread:$0]  %s299_s0, 128, %s18_s13, [#allocation3]  }
  0x13   :  { %s176_s28 = scalar_lea.hbm %s300_s1, 256 }
  0x14   :  { %p177_p8 = scmp.ne.s32.totalorder %s300_s1, %s176_s28  ;;  %p180_p9 = scmp.lt.u32.totalorder %s176_s28, %s300_s1 }
  0x16   :  { %p182_p10 = pnand %p180_p9, %p177_p8 }
  0x18   :  { %185 = shalt.err (!%p182_p10)
}
  0x19   :  { %s186_s6 = scalar_lea.vmem %s253_s15, 256  ;;  %p191_p12 = scmp.lt.s32.totalorder %s253_s15, %s253_s15 }
  0x1a   :  { %p187_p11 = scmp.ne.s32.totalorder %s253_s15, %s186_s6  ;;  %p192_p13 = scmp.lt.s32.totalorder %s186_s6, %s186_s6 }
  0x1c   :  { %p193_p0 = por %p192_p13, %p191_p12 }
  0x1e   :  { %p194_p1 = pnand %p193_p0, %p187_p11 }
  0x20   :  { %197 = shalt.err (!%p194_p1)
}
  0x21   :  { %s228_s0 = smov 64   ;;  %s229_s7 = smov 4  }
  0x22   :  { %32 = dma.hbm_to_vmem [thread:$0]  %s300_s1, 256, %s253_s15, [#allocation6], %s228_s0, %s228_s0, %s229_s7  }
  0x23   :  { %220 = dma.done.wait [#allocation3], 128  }
  0x24   :  { %221 = vsyncadd [#allocation3], 4294967168 }
  0x25   :  { %222 = dma.done.wait [#allocation6], 256  }
  0x26   :  { %223 = vsyncadd [#allocation6], 4294967040  ;;  %v230_v0 = vmov 0.0   ;;  %vm231_vm0 = vmmov 0   ;;  %v152_v1 = vld [vmem:[#allocation5] sm:$0xff]   ;;  %v153_v2 = vld [vmem:[#allocation5 + $0x8] sm:$0xff]  }
  0x27   :  { %137 = vmatprep.subr.bf16.mxu0 %v230_v0  ;;  %141 = vmatprep.mubr.msk.bf16.mxu0 %vm231_vm0, %v230_v0  ;;  %v42_v3 = vld [vmem:[#allocation2] sm:$0xff]  ;;  %vm67_vm1 = vcmask 261120   ;;  %s232_s1 = smov [#allocation7]   ;;  %vm112_vm2 = vcmask 519168  }
  0x28   :  { %138 = vmatpush3.bf16.msra.mxu0 %v152_v1  ;;  %v43_v4 = vpack.c.bf16 %v42_v3, %v42_v3  ;;  %v130_v5 = vld [vmem:[%s301_s2] ss:$0 sm:$0xff]  ;;  %s120_s12 = sshll.u32 %s232_s1, 4  ;;  %s121_s12 = int_to_ptr.vmem [resolvable:$true] %s120_s12 }
  0x29   :  { %139 = vmatprep.subr.bf16.mxu0 %v230_v0  ;;  %s198_s13 = scalar_lea.vmem %s121_s12, 64  ;;  %p203_p3 = scmp.lt.s32.totalorder %s121_s12, %s121_s12 }
  0x2a   :  { %p199_p2 = scmp.ne.s32.totalorder %s121_s12, %s198_s13  ;;  %p204_p4 = scmp.lt.s32.totalorder %s198_s13, %s198_s13 }
  0x2c   :  { %140 = vmatpush3.bf16.msra.mxu0 %v153_v2  ;;  %p205_p5 = por %p204_p4, %p203_p3 }
  0x2e   :  { %p206_p6 = pnand %p205_p5, %p199_p2 }
  0x2f   :  { %142 = vmatmul.mubr.msk.bf16.vlgmr.msra.gmra.mrb[0].mxu0 %vm67_vm1, %v43_v4 }
 0x102   :  { %v105_v6 = vpop.f32.mrb[0].mxu0 }
 0x103   :  { %v106_v7 = vadd.f32 %v130_v5, %v105_v6  ;;  %v143_v8 = vpop.f32.mrb[1].mxu0 }
 0x104   :  { %v108_v9 = vpop.f32.mrb[2].mxu0 }
 0x105   :  { %v111_v10 = vpack.c.bf16 %v106_v7, %v106_v7  ;;  %v144_v11 = vpop.f32.mrb[3].mxu0 }
 0x107   :  { %113 = vst.msk [vmem:[#allocation7] sm:$0xf] %vm112_vm2, %v111_v10 }
 0x108   :  { %209 = shalt.err (!%p206_p6)
}
 0x109   :  { %s210_s15 = scalar_lea.hbm %s302_s3, 64 }
 0x10a   :  { %p211_p7 = scmp.ne.s32.totalorder %s302_s3, %s210_s15  ;;  %p214_p8 = scmp.lt.u32.totalorder %s210_s15, %s302_s3 }
 0x10c   :  { %p216_p9 = pnand %p214_p8, %p211_p7 }
 0x10e   :  { %219 = shalt.err (!%p216_p9)
}
 0x10f   :  { %123 = dma.vmem_to_hbm [thread:$0]  %s121_s12, 64, %s302_s3, [#allocation4]  }
 0x110   :  { %224 = dma.done.wait [#allocation4], 64  }
 0x111   :  { %225 = vsyncadd [#allocation4], 4294967232 }
 0x112   :  { %127 = vsyncpa [#allocation3], 1 }
 0x113   :  { %128 = vsyncpa [#allocation6], 1 }
 0x114   :  { %129 = vsyncpa [#allocation4], 1 }

</bundles_post_ra>
